<compile_context>
chip_gen: v5e
topology: v5e:2x2
jax: 0.10.0
libtpu: 0.0.40
codegen_flags: <defaults>
</compile_context>

<pallas_src>
import jax
import jax.numpy as jnp
from jax.experimental import pallas as pl
from jax.experimental.pallas import tpu as pltpu

_LANE = 128
_SUBLANE = 8
_TILE_CAP = 512          # tm/tn/tk cap: big enough to amortize per-step overhead,
                         # small enough (double-buffered) for v5e/v6e/v7x VMEM.
_VMEM_FLOOR = 32 << 20
_VMEM_CEIL = 48 << 20    # stays under v7x's 64 MiB physical VMEM with headroom.


def _round_up(x, m):
    return ((x + m - 1) // m) * m


def _pick_tile(total, cap):
    """Largest multiple of 128 that divides `total` (itself a 128-multiple), <= cap."""
    t = max(_LANE, (min(total, cap) // _LANE) * _LANE)
    while total % t != 0:
        t -= _LANE
    return t


# ---------------------------------------------------------------------------
# Parameter preparation (outside the hot path).
# ---------------------------------------------------------------------------
def prepare_embedding_params(weight, bias, *, param_dtype=jnp.bfloat16):
    """weight: (d_out, d_in) [PyTorch nn.Linear layout], bias: (d_out,).

    Returns (w_p, b_p, d_out):
      w_p: (k_pad, n_pad) pre-transposed weight, zero-padded so both the
           contraction (K) and output (N) dims are 128 multiples; stored in
           `param_dtype` (bf16 default -> half the HBM stream, bf16 MXU rate).
      b_p: (1, n_pad) zero-padded f32 bias (added in the f32 epilogue).
    Kernels compute y = x_kpad @ w_p + b_p; valid output is y[:, :d_out].
    """
    d_out, d_in = weight.shape
    n_pad = _round_up(max(d_out, _LANE), _LANE)
    k_pad = _round_up(max(d_in, _LANE), _LANE)
    w_p = (jnp.zeros((k_pad, n_pad), param_dtype)
           .at[:d_in, :d_out].set(weight.T.astype(param_dtype)))
    b_p = (jnp.zeros((1, n_pad), jnp.float32)
           .at[0, :d_out].set(bias.astype(jnp.float32)))
    return w_p, b_p, d_out


def _pad_input(x, k_pad, m_pad):
    m, d_in = x.shape
    if m == m_pad and d_in == k_pad:
        return x
    return jnp.pad(x, ((0, m_pad - m), (0, k_pad - d_in)))


# ---------------------------------------------------------------------------
# Small-shape path: gridless fused kernel, weight loaded once for all branches.
# ---------------------------------------------------------------------------
def _fused_kernel(*refs):
    """refs = (x_0..x_{n-1}, w, b, o_0..o_{n-1}); each a full VMEM block."""
    n = (len(refs) - 2) // 2
    w = refs[n][...]          # (k_pad, n_pad), shared across branches
    b = refs[n + 1][...]      # (1, n_pad), f32
    for x_ref, o_ref in zip(refs[:n], refs[n + 2:]):
        acc = jnp.dot(x_ref[...].astype(w.dtype), w,
                      preferred_element_type=jnp.float32)
        o_ref[...] = (acc + b).astype(o_ref.dtype)


def _fused_linear(xs, w_p, b_p):
    n = len(xs)
    m_pad, k_pad = xs[0].shape
    n_pad = w_p.shape[1]
    x_it = xs[0].dtype.itemsize
    w_it = w_p.dtype.itemsize
    b_it = b_p.dtype.itemsize

    out_sds = jax.ShapeDtypeStruct((m_pad, n_pad), xs[0].dtype)
    bytes_accessed = (n * m_pad * k_pad * x_it + k_pad * n_pad * w_it
                      + n_pad * b_it + n * m_pad * n_pad * x_it)
    footprint = bytes_accessed + n * m_pad * n_pad * 4   # f32 epilogue temporaries
    vmem_spec = pl.BlockSpec(memory_space=pltpu.MemorySpace.VMEM)

    return pl.pallas_call(
        _fused_kernel,
        out_shape=tuple(out_sds for _ in range(n)),
        in_specs=[vmem_spec] * (n + 2),
        out_specs=tuple(vmem_spec for _ in range(n)),
        compiler_params=pltpu.CompilerParams(
            vmem_limit_bytes=int(min(max(2 * footprint, 16 << 20), _VMEM_CEIL))),
        cost_estimate=pl.CostEstimate(
            flops=2 * n * m_pad * k_pad * n_pad, transcendentals=0,
            bytes_accessed=bytes_accessed),
    )(*xs, w_p, b_p)


# ---------------------------------------------------------------------------
# Scalable path: tiled matmul; all Siamese branches share each weight tile.
# ---------------------------------------------------------------------------
def _make_tiled_kernel_single_k(n):
    """K fits in one tile: no accumulator scratch, direct store."""
    def kernel(*refs):
        w = refs[n][...]
        b = refs[n + 1][...]
        for x_ref, o_ref in zip(refs[:n], refs[n + 2:]):
            acc = jnp.dot(x_ref[...].astype(w.dtype), w,
                          preferred_element_type=jnp.float32)
            o_ref[...] = (acc + b).astype(o_ref.dtype)
    return kernel


def _make_tiled_kernel_multi_k(n):
    """K-axis reduction with one f32 VMEM accumulator per branch."""
    def kernel(*refs):
        xs = refs[:n]
        w_ref, b_ref = refs[n], refs[n + 1]
        outs = refs[n + 2:n + 2 + n]
        accs = refs[n + 2 + n:]
        k = pl.program_id(2)

        @pl.when(k == 0)
        def _init():
            for acc in accs:
                acc[...] = jnp.zeros_like(acc)

        w = w_ref[...]
        for x_ref, acc in zip(xs, accs):
            acc[...] += jnp.dot(x_ref[...].astype(w.dtype), w,
                                preferred_element_type=jnp.float32)

        @pl.when(k == pl.num_programs(2) - 1)
        def _store():
            b = b_ref[...]
            for acc, o_ref in zip(accs, outs):
                o_ref[...] = (acc[...] + b).astype(o_ref.dtype)
    return kernel


def _tiled_linear(xs, w_p, b_p, *, tile_cap=_TILE_CAP):
    """y_i = x_i @ w_p + b_p for all branches in ONE pallas_call."""
    n = len(xs)
    m, _ = xs[0].shape
    k_pad, n_pad = w_p.shape

    # M tiling: near-even, sublane-aligned split (avoids ~2x padding waste).
    num_m = -(-m // tile_cap)
    tm = _round_up(-(-m // num_m), _SUBLANE)
    m_pad = _round_up(m, tm)

    # N / K tiling: 128-multiple divisors of the padded dims, capped at tile_cap.
    tn = _pick_tile(n_pad, tile_cap)
    tk = _pick_tile(k_pad, tile_cap)

    # Keep the "parallel" grid product >= 2 so both v7x TensorCores get work.
    if (m_pad // tm) * (n_pad // tn) < 2:
        if n_pad >= 2 * _LANE:
            tn = _pick_tile(n_pad, n_pad // 2)
        elif m > _SUBLANE:
            tm = _round_up(-(-m // 2), _SUBLANE)
            m_pad = _round_up(m, tm)

    xs = tuple(_pad_input(x, k_pad, m_pad) for x in xs)

    x_it = xs[0].dtype.itemsize
    w_it = w_p.dtype.itemsize
    b_it = b_p.dtype.itemsize
    nk = k_pad // tk

    out_sds = tuple(jax.ShapeDtypeStruct((m_pad, n_pad), xs[0].dtype)
                    for _ in range(n))
    flops = 2 * n * m_pad * k_pad * n_pad
    bytes_accessed = (n * m_pad * k_pad * x_it + k_pad * n_pad * w_it
                      + n_pad * b_it + n * m_pad * n_pad * x_it)
    # Double-buffered pipeline buffers + (single-buffered) f32 accumulators.
    buf_bytes = (n * tm * tk * x_it + tk * tn * w_it + tn * b_it
                 + n * tm * tn * x_it)
    vmem_bytes = 2 * buf_bytes + (0 if nk == 1 else n * tm * tn * 4)
    vmem_limit = int(min(max(2 * vmem_bytes, _VMEM_FLOOR), _VMEM_CEIL))

    if nk == 1:
        grid = (m_pad // tm, n_pad // tn)
        in_specs = ([pl.BlockSpec((tm, tk), lambda i, j: (i, 0))] * n
                    + [pl.BlockSpec((tk, tn), lambda i, j: (0, j)),
                       pl.BlockSpec((1, tn), lambda i, j: (0, j))])
        out_specs = tuple(pl.BlockSpec((tm, tn), lambda i, j: (i, j))
                          for _ in range(n))
        kernel = _make_tiled_kernel_single_k(n)
        scratch = []
        dims = ("parallel", "parallel")
    else:
        grid = (m_pad // tm, n_pad // tn, nk)
        in_specs = ([pl.BlockSpec((tm, tk), lambda i, j, k: (i, k))] * n
                    + [pl.BlockSpec((tk, tn), lambda i, j, k: (k, j)),
                       pl.BlockSpec((1, tn), lambda i, j, k: (0, j))])
        out_specs = tuple(pl.BlockSpec((tm, tn), lambda i, j, k: (i, j))
                          for _ in range(n))
        kernel = _make_tiled_kernel_multi_k(n)
        scratch = [pltpu.VMEM((tm, tn), jnp.float32) for _ in range(n)]
        dims = ("parallel", "parallel", "arbitrary")

    return pl.pallas_call(
        kernel,
        out_shape=out_sds,
        grid_spec=pltpu.PrefetchScalarGridSpec(
            num_scalar_prefetch=0, grid=grid,
            in_specs=in_specs, out_specs=out_specs,
            scratch_shapes=scratch),
        compiler_params=pltpu.CompilerParams(
            dimension_semantics=dims, vmem_limit_bytes=vmem_limit),
        cost_estimate=pl.CostEstimate(flops=flops, transcendentals=0,
                                      bytes_accessed=bytes_accessed),
    )(*xs, w_p, b_p)


# ---------------------------------------------------------------------------
# SiameseNet forward / get_embedding.
# ---------------------------------------------------------------------------
def _embed(xs, w_p, b_p, d_out, single_block_limit_bytes):
    n = len(xs)
    b, _ = xs[0].shape
    k_pad, n_pad = w_p.shape
    b_pad = _round_up(b, _SUBLANE)
    x_it = xs[0].dtype.itemsize
    footprint = (n * b_pad * k_pad * x_it + k_pad * n_pad * w_p.dtype.itemsize
                 + n_pad * b_p.dtype.itemsize
                 + n * b_pad * n_pad * (x_it + 4))
    if footprint <= single_block_limit_bytes:
        xs = tuple(_pad_input(x, k_pad, b_pad) for x in xs)
        outs = _fused_linear(xs, w_p, b_p)
    else:
        outs = _tiled_linear(xs, w_p, b_p)
    return tuple(o[:b, :d_out] for o in outs)


def siamese_forward(x1, x2, w_p, b_p, d_out, *, single_block_limit_bytes=24 << 20):
    """SiameseNet.forward: (emb(x1), emb(x2)) with a shared linear embedding."""
    assert x1.shape == x2.shape and x1.dtype == x2.dtype
    o1, o2 = _embed((x1, x2), w_p, b_p, d_out, single_block_limit_bytes)
    return o1, o2


def get_embedding(x, w_p, b_p, d_out, *, single_block_limit_bytes=24 << 20):
    """SiameseNet.get_embedding: emb(x)."""
    (o,) = _embed((x,), w_p, b_p, d_out, single_block_limit_bytes)
    return o


if __name__ == "__main__":
    key = jax.random.PRNGKey(0)
    hi = jax.lax.Precision.HIGHEST

    # --- 1) Small config (linear embedding head) — fused gridless path, f32. ---
    input_dim, out_dim, batch = 10, 3, 8
    k1, k2, kw, kb = jax.random.split(key, 4)
    bound = 1.0 / (input_dim ** 0.5)
    weight = jax.random.uniform(kw, (out_dim, input_dim), jnp.float32, -bound, bound)
    bias = jax.random.uniform(kb, (out_dim,), jnp.float32, -bound, bound)
    x1 = jax.random.normal(k1, (batch, input_dim), jnp.float32)
    x2 = jax.random.normal(k2, (batch, input_dim), jnp.float32)

    w_p, b_p, d_out = prepare_embedding_params(weight, bias, param_dtype=jnp.float32)
    o1, o2 = siamese_forward(x1, x2, w_p, b_p, d_out)
    jax.block_until_ready((o1, o2))

    r1 = x1 @ weight.T + bias
    r2 = x2 @ weight.T + bias
    assert o1.shape == (batch, out_dim) and o2.shape == (batch, out_dim)
    assert jnp.allclose(o1, r1, atol=1e-5, rtol=1e-5)
    assert jnp.allclose(o2, r2, atol=1e-5, rtol=1e-5)

    e = get_embedding(x1, w_p, b_p, d_out)
    jax.block_until_ready(e)
    assert jnp.allclose(e, r1, atol=1e-5, rtol=1e-5)

    # --- 2) Tiled single-K path, bf16 weights (forced via threshold). -----------
    in2, out2, b2 = 512, 256, 64
    k3, k4, kw2, kb2 = jax.random.split(jax.random.PRNGKey(0), 4)
    bd2 = 1.0 / (in2 ** 0.5)
    weight2 = jax.random.uniform(kw2, (out2, in2), jnp.float32, -bd2, bd2)
    bias2 = jax.random.uniform(kb2, (out2,), jnp.float32, -bd2, bd2)
    y1 = jax.random.normal(k3, (b2, in2), jnp.float32)
    y2 = jax.random.normal(k4, (b2, in2), jnp.float32)

    w_p2, b_p2, d_out2 = prepare_embedding_params(weight2, bias2)   # bf16 default
    t1, t2 = siamese_forward(y1, y2, w_p2, b_p2, d_out2, single_block_limit_bytes=0)
    jax.block_until_ready((t1, t2))

    wb2 = weight2.astype(jnp.bfloat16).astype(jnp.float32)
    s1 = jnp.dot(y1.astype(jnp.bfloat16).astype(jnp.float32), wb2.T, precision=hi) + bias2
    s2 = jnp.dot(y2.astype(jnp.bfloat16).astype(jnp.float32), wb2.T, precision=hi) + bias2
    assert t1.shape == (b2, out2) and t2.shape == (b2, out2)
    assert jnp.allclose(t1, s1, atol=1e-2, rtol=1e-2)
    assert jnp.allclose(t2, s2, atol=1e-2, rtol=1e-2)

    # --- 3) Tiled multi-K path (K accumulation), non-128-multiple d_in. ---------
    in3, out3, b3 = 1027, 200, 48
    k5, k6, kw3, kb3 = jax.random.split(jax.random.PRNGKey(1), 4)
    bd3 = 1.0 / (in3 ** 0.5)
    weight3 = jax.random.uniform(kw3, (out3, in3), jnp.float32, -bd3, bd3)
    bias3 = jax.random.uniform(kb3, (out3,), jnp.float32, -bd3, bd3)
    z1 = jax.random.normal(k5, (b3, in3), jnp.float32)
    z2 = jax.random.normal(k6, (b3, in3), jnp.float32)

    w_p3, b_p3, d_out3 = prepare_embedding_params(weight3, bias3)   # bf16 default
    u1, u2 = siamese_forward(z1, z2, w_p3, b_p3, d_out3, single_block_limit_bytes=0)
    jax.block_until_ready((u1, u2))

    wb3 = weight3.astype(jnp.bfloat16).astype(jnp.float32)
    v1 = jnp.dot(z1.astype(jnp.bfloat16).astype(jnp.float32), wb3.T, precision=hi) + bias3
    v2 = jnp.dot(z2.astype(jnp.bfloat16).astype(jnp.float32), wb3.T, precision=hi) + bias3
    assert u1.shape == (b3, out3) and u2.shape == (b3, out3)
    assert jnp.allclose(u1, v1, atol=1e-2, rtol=1e-2)
    assert jnp.allclose(u2, v2, atol=1e-2, rtol=1e-2)

    ge = get_embedding(z1, w_p3, b_p3, d_out3, single_block_limit_bytes=0)
    jax.block_until_ready(ge)
    assert jnp.allclose(ge, v1, atol=1e-2, rtol=1e-2)

    print("KERNEL_OK")
</pallas_src>

<mosaic_0001>
module attributes {stable_mosaic.version = 11 : i64} {
  func.func @_fused_kernel(%arg0: memref<8x128xf32, #tpu.memory_space<vmem>>, %arg1: memref<8x128xf32, #tpu.memory_space<vmem>>, %arg2: memref<128x128xf32, #tpu.memory_space<vmem>>, %arg3: memref<1x128xf32, #tpu.memory_space<vmem>>, %arg4: memref<8x128xf32, #tpu.memory_space<vmem>>, %arg5: memref<8x128xf32, #tpu.memory_space<vmem>>) attributes {dimension_semantics = [], scalar_prefetch = 0 : i64, scratch_operands = 0 : i64, tpu.core_type = #tpu.core_type<tc>} {
    %c0 = arith.constant 0 : index
    %c0_0 = arith.constant 0 : index
    %0 = vector.load %arg2[%c0, %c0_0] : memref<128x128xf32, #tpu.memory_space<vmem>>, vector<128x128xf32>
    %c0_1 = arith.constant 0 : index
    %c0_2 = arith.constant 0 : index
    %1 = vector.load %arg3[%c0_1, %c0_2] : memref<1x128xf32, #tpu.memory_space<vmem>>, vector<1x128xf32>
    %c0_3 = arith.constant 0 : index
    %c0_4 = arith.constant 0 : index
    %2 = vector.load %arg0[%c0_3, %c0_4] : memref<8x128xf32, #tpu.memory_space<vmem>>, vector<8x128xf32>
    %cst = arith.constant dense<0.000000e+00> : vector<8x128xf32>
    %3 = tpu.matmul %2, %0, %cst {dimension_numbers = #tpu.dot_dimension_numbers<[1], [0], [0], [1], [0, 0, 1, 1], [], []>} : vector<8x128xf32>, vector<128x128xf32>, vector<8x128xf32> -> vector<8x128xf32>
    %4 = vector.broadcast %1 : vector<1x128xf32> to vector<8x128xf32>
    %5 = arith.addf %3, %4 : vector<8x128xf32>
    %c0_5 = arith.constant 0 : index
    %c0_6 = arith.constant 0 : index
    %6 = vector.load %arg4[%c0_5, %c0_6] : memref<8x128xf32, #tpu.memory_space<vmem>>, vector<8x128xf32>
    tpu.vector_store %arg4[%c0_5, %c0_6], %5 {strides = array<i32>} : memref<8x128xf32, #tpu.memory_space<vmem>>, vector<8x128xf32>,
    %c0_7 = arith.constant 0 : index
    %c0_8 = arith.constant 0 : index
    %7 = vector.load %arg1[%c0_7, %c0_8] : memref<8x128xf32, #tpu.memory_space<vmem>>, vector<8x128xf32>
    %cst_9 = arith.constant dense<0.000000e+00> : vector<8x128xf32>
    %8 = tpu.matmul %7, %0, %cst_9 {dimension_numbers = #tpu.dot_dimension_numbers<[1], [0], [0], [1], [0, 0, 1, 1], [], []>} : vector<8x128xf32>, vector<128x128xf32>, vector<8x128xf32> -> vector<8x128xf32>
    %9 = vector.broadcast %1 : vector<1x128xf32> to vector<8x128xf32>
    %10 = arith.addf %8, %9 : vector<8x128xf32>
    %c0_10 = arith.constant 0 : index
    %c0_11 = arith.constant 0 : index
    %11 = vector.load %arg5[%c0_10, %c0_11] : memref<8x128xf32, #tpu.memory_space<vmem>>, vector<8x128xf32>
    tpu.vector_store %arg5[%c0_10, %c0_11], %10 {strides = array<i32>} : memref<8x128xf32, #tpu.memory_space<vmem>>, vector<8x128xf32>,
    return
  }
}

</mosaic_0001>

<bundles_post_ra>
// kernel: tpu_custom_call.1
= control target key start
LH: loop header
LB: loop body
LE: loop exit
PB: predicated region body
PF: predicated region fallthrough
CT: control target
= control target key end

     0   :  { %11 = vsyncpa [#allocation3], 0  ;;  %s353_s0 = inlined_call_operand.hbm [shape: f32[8,128], index: 0, kind: input, shape index: {}]   ;;  %s354_s1 = inlined_call_operand.hbm [shape: f32[8,128], index: 1, kind: input, shape index: {}]   ;;  %s355_s2 = inlined_call_operand.hbm [shape: f32[128,128], index: 2, kind: input, shape index: {}]   ;;  %s356_s3 = inlined_call_operand.vmem [shape: f32[1,128], index: 3, kind: input, shape index: {}]   ;;  %s357_s4 = inlined_call_operand.hbm [shape: f32[8,128], index: 4, kind: output, shape index: {0}]   ;;  %s358_s5 = inlined_call_operand.hbm [shape: f32[8,128], index: 5, kind: output, shape index: {1}]  }
   0x1   :  { %12 = vsyncpa [#allocation6], 0 }
   0x2   :  { %13 = vsyncpa [#allocation4], 0  ;;  %s31_s20 = sshll.u32 %s354_s1, 4  ;;  %s32_s20 = int_to_ptr.hbm [resolvable:$true] %s31_s20 }
   0x3   :  { %14 = vsyncpa [#allocation10], 0  ;;  %s298_s21 = smov [#allocation5]   ;;  %s20_s25 = sshll.u32 %s353_s0, 4  ;;  %s21_s25 = int_to_ptr.hbm [resolvable:$true] %s20_s25 }
   0x4   :  { %s33_s22 = sshll.u32 %s298_s21, 4  ;;  %s299_s26 = smov [#allocation2]   ;;  %s34_s22 = int_to_ptr.vmem [resolvable:$true] %s33_s22 }
   0x5   :  { %36 = dma.hbm_to_vmem [thread:$0]  %s32_s20, 128, %s34_s22, [#allocation6]  }
   0x6   :  { %s22_s27 = sshll.u32 %s299_s26, 4  ;;  %s41_s30 = sshll.u32 %s355_s2, 4  ;;  %s23_s27 = int_to_ptr.vmem [resolvable:$true] %s22_s27  ;;  %s42_s30 = int_to_ptr.hbm [resolvable:$true] %s41_s30 }
   0x7   :  { %25 = dma.hbm_to_vmem [thread:$0]  %s21_s25, 128, %s23_s27, [#allocation3]  }
   0x8   :  { %s300_s1 = smov [#allocation7]   ;;  %s301_s7 = smov 128  }
   0x9   :  { %s43_s6 = sshll.u32 %s300_s1, 4  ;;  %s302_s8 = smov 8   ;;  %s44_s6 = int_to_ptr.vmem [resolvable:$true] %s43_s6 }
   0xa   :  { %49 = dma.hbm_to_vmem [thread:$0]  %s42_s30, 2048, %s44_s6, [#allocation6], %s301_s7, %s301_s7, %s302_s8  }
   0xb   :  { %290 = dma.done.wait [#allocation3], 128  }
   0xc   :  { %291 = vsyncadd [#allocation3], 4294967168 }
   0xd   :  { %292 = dma.done.wait [#allocation6], 2176  }
   0xe   :  { %293 = vsyncadd [#allocation6], 4294965120  ;;  %v79_v0 = vld [vmem:[#allocation7 + $0x78] sm:$0xff]  ;;  %v78_v1 = vld [vmem:[#allocation7 + $0x70] sm:$0xff]  ;;  %s303_s9 = smov [#allocation8]   ;;  %s135_s13 = sshll.u32 %s357_s4, 4  ;;  %s136_s13 = int_to_ptr.hbm [resolvable:$true] %s135_s13 }
   0xf   :  { %85 = vmatpush.msra.mxu0 %v79_v0  ;;  %107 = vmatpush.msra.mxu1 %v79_v0  ;;  %v77_v2 = vld [vmem:[#allocation7 + $0x68] sm:$0xff]  ;;  %v76_v3 = vld [vmem:[#allocation7 + $0x60] sm:$0xff]  ;;  %v75_v4 = vld [vmem:[#allocation7 + $0x58] sm:$0xff]  ;;  %s133_s10 = sshll.u32 %s303_s9, 4  ;;  %s304_s14 = smov [#allocation9]   ;;  %s134_s10 = int_to_ptr.vmem [resolvable:$true] %s133_s10 }
  0x10   :  { %v74_v5 = vld [vmem:[#allocation7 + $0x50] sm:$0xff]  ;;  %v73_v6 = vld [vmem:[#allocation7 + $0x48] sm:$0xff]  ;;  %v72_v7 = vld [vmem:[#allocation7 + $0x40] sm:$0xff]  ;;  %s144_s15 = sshll.u32 %s304_s14, 4  ;;  %s146_s18 = sshll.u32 %s358_s5, 4  ;;  %s145_s15 = int_to_ptr.vmem [resolvable:$true] %s144_s15  ;;  %s147_s18 = int_to_ptr.hbm [resolvable:$true] %s146_s18 }
  0x11   :  { %86 = vmatpush.msra.mxu0 %v78_v1  ;;  %108 = vmatpush.msra.mxu1 %v78_v1  ;;  %v71_v8 = vld [vmem:[#allocation7 + $0x38] sm:$0xff]  ;;  %v70_v9 = vld [vmem:[#allocation7 + $0x30] sm:$0xff]  ;;  %v69_v10 = vld [vmem:[#allocation7 + $0x28] sm:$0xff] }
  0x12   :  { %v68_v11 = vld [vmem:[#allocation7 + $0x20] sm:$0xff]  ;;  %v67_v12 = vld [vmem:[#allocation7 + $0x18] sm:$0xff]  ;;  %v66_v13 = vld [vmem:[#allocation7 + $0x10] sm:$0xff] }
  0x13   :  { %87 = vmatpush.msra.mxu0 %v77_v2  ;;  %109 = vmatpush.msra.mxu1 %v77_v2  ;;  %v65_v14 = vld [vmem:[#allocation7 + $0x8] sm:$0xff]  ;;  %v64_v15 = vld [vmem:[#allocation7] sm:$0xff]  ;;  %v81_v16 = vld [vmem:[#allocation2] sm:$0xff] }
  0x14   :  { %v106_v17 = vld [vmem:[#allocation5] sm:$0xff]  ;;  %v169_v18 = vld [vmem:[%s356_s3] ss:$0 sm:$0xff] }
  0x15   :  { %88 = vmatpush.msra.mxu0 %v76_v3  ;;  %110 = vmatpush.msra.mxu1 %v76_v3 }
  0x17   :  { %89 = vmatpush.msra.mxu0 %v75_v4  ;;  %111 = vmatpush.msra.mxu1 %v75_v4 }
  0x19   :  { %90 = vmatpush.msra.mxu0 %v74_v5  ;;  %112 = vmatpush.msra.mxu1 %v74_v5 }
  0x1b   :  { %91 = vmatpush.msra.mxu0 %v73_v6  ;;  %113 = vmatpush.msra.mxu1 %v73_v6 }
  0x1d   :  { %92 = vmatpush.msra.mxu0 %v72_v7  ;;  %114 = vmatpush.msra.mxu1 %v72_v7 }
  0x1f   :  { %93 = vmatpush.msra.mxu0 %v71_v8  ;;  %115 = vmatpush.msra.mxu1 %v71_v8 }
  0x21   :  { %94 = vmatpush.msra.mxu0 %v70_v9  ;;  %116 = vmatpush.msra.mxu1 %v70_v9 }
  0x23   :  { %95 = vmatpush.msra.mxu0 %v69_v10  ;;  %117 = vmatpush.msra.mxu1 %v69_v10 }
  0x25   :  { %96 = vmatpush.msra.mxu0 %v68_v11  ;;  %118 = vmatpush.msra.mxu1 %v68_v11 }
  0x27   :  { %97 = vmatpush.msra.mxu0 %v67_v12  ;;  %119 = vmatpush.msra.mxu1 %v67_v12 }
  0x29   :  { %98 = vmatpush.msra.mxu0 %v66_v13  ;;  %120 = vmatpush.msra.mxu1 %v66_v13 }
  0x2b   :  { %99 = vmatpush.msra.mxu0 %v65_v14  ;;  %121 = vmatpush.msra.mxu1 %v65_v14 }
  0x2d   :  { %100 = vmatpush.msra.mxu0 %v64_v15  ;;  %122 = vmatpush.msra.mxu1 %v64_v15 }
  0x2e   :  { %101 = vmatmul.f32.vlgmr.msra.gmra.mxu0 %v81_v16  ;;  %123 = vmatmul.f32.vlgmr.msra.gmra.mxu1 %v106_v17 }
  0xab   :  { %v102_v19 = vpop.f32.mrf.mxu0  ;;  %v124_v20 = vpop.f32.mrf.mxu1 }
  0xac   :  { %v103_v21 = vadd.f32 %v169_v18, %v102_v19  ;;  %v125_v22 = vadd.f32 %v169_v18, %v124_v20 }
  0xae   :  { %105 = vst [vmem:[#allocation8] sm:$0xff] %v103_v21 }
  0xaf   :  { %127 = vst [vmem:[#allocation9] sm:$0xff] %v125_v22  ;;  %138 = dma.vmem_to_hbm [thread:$0]  %s134_s10, 128, %s136_s13, [#allocation4]  }
  0xb0   :  { %149 = dma.vmem_to_hbm [thread:$0]  %s145_s15, 128, %s147_s18, [#allocation10]  }
  0xb1   :  { %294 = dma.done.wait [#allocation4], 128  }
  0xb2   :  { %295 = vsyncadd [#allocation4], 4294967168 }
  0xb3   :  { %296 = dma.done.wait [#allocation10], 128  }
  0xb4   :  { %297 = vsyncadd [#allocation10], 4294967168 }
  0xb5   :  { %158 = vsyncpa [#allocation3], 1 }
  0xb6   :  { %159 = vsyncpa [#allocation6], 1 }
  0xb7   :  { %160 = vsyncpa [#allocation4], 1 }
  0xb8   :  { %161 = vsyncpa [#allocation10], 1 }

</bundles_post_ra>
